<compile_context>
chip_gen: v7x
topology: tpu7x:2x2x1
jax: 0.10.0
libtpu: 0.0.40
codegen_flags: <defaults>
</compile_context>

<pallas_src>
import functools

import jax
import jax.numpy as jnp
from jax.experimental import pallas as pl
from jax.experimental.pallas import tpu as pltpu


def _round_up(x, m):
    return (x + m - 1) // m * m


def _patch_embed_kernel(p_ref, w_ref, b_ref, o_ref):
    """One (batch, HW-tile) block:  o[E, T] = W[E, K] @ P[K, T] + b[E, 1]."""
    acc = jnp.dot(w_ref[...], p_ref[0], preferred_element_type=jnp.float32)
    o_ref[0] = (acc + b_ref[...]).astype(o_ref.dtype)


def _im2col_k_major(x, patch_size, stride, padding):
    """x: [B, C, H, W] -> patches [B, C*p*p, Ho*Wo] (K is c-major, then ki, kj)."""
    B, C, H, W = x.shape
    p, s = patch_size, stride
    Ho = (H + 2 * padding - p) // s + 1
    Wo = (W + 2 * padding - p) // s + 1

    if s == p and padding == 0 and H % p == 0 and W % p == 0:
        # Non-overlapping patches (the PatchEmbed default): one fused
        # reshape + transpose (already in bf16 thanks to the caller).
        pat = x.reshape(B, C, Ho, p, Wo, p)
        pat = jnp.transpose(pat, (0, 1, 3, 5, 2, 4))       # [B, C, ki, kj, Ho, Wo]
        return pat.reshape(B, C * p * p, Ho * Wo), (Ho, Wo)

    # Generic (overlapping / padded) path: single fused patch-extraction op.
    # Output channel order is c-major then (ki, kj) -> matches weight.reshape(E, C*p*p).
    pat = jax.lax.conv_general_dilated_patches(
        x, filter_shape=(p, p), window_strides=(s, s),
        padding=[(padding, padding), (padding, padding)],
        dimension_numbers=("NCHW", "OIHW", "NCHW"))        # [B, C*p*p, Ho, Wo]
    return pat.reshape(B, C * p * p, Ho * Wo), (Ho, Wo)


def _choose_tile_hw(hw, batch):
    """Lane-dense HW tile: large multiple of 128 without big last-tile overshoot."""
    if hw <= 128:
        return hw                                  # single full-extent block, exact
    cap = min(1024, _round_up(hw, 128))
    tile = 128
    for cand in (1024, 512, 256, 128):
        if cand <= cap and ((-hw) % cand) * 4 <= hw:   # overshoot <= 25% of work
            tile = cand
            break
    n_tiles = -(-hw // tile)
    if batch == 1 and n_tiles == 1 and tile > 128:
        # v7x has 2 TensorCores: keep at least 2 grid steps so both get work.
        tile = max(128, _round_up(-(-hw // 2), 128))
    return tile


@functools.partial(jax.jit, static_argnames=("patch_size", "stride", "padding"))
def patch_embed_forward(x, weight, bias, *, patch_size, stride, padding):
    """x: [B, C, H, W], weight: [E, C, p, p], bias: [E] -> NCHW [B, E, Ho, Wo]."""
    B, C, H, W = x.shape
    E = weight.shape[0]
    p = patch_size
    K = C * p * p

    # bf16 BEFORE patch extraction: halves pre-kernel HBM traffic; the GEMM
    # accumulates in f32 and the bias add is f32.
    x_bf16 = x.astype(jnp.bfloat16)
    patches, (Ho, Wo) = _im2col_k_major(x_bf16, patch_size, stride, padding)
    HW = Ho * Wo

    w_mat = weight.reshape(E, K).astype(jnp.bfloat16)       # [E, K] (c, ki, kj)
    b_col = bias.reshape(E, 1).astype(jnp.float32)          # [E, 1]

    TILE_HW = _choose_tile_hw(HW, B)
    n_hw = -(-HW // TILE_HW)

    # VMEM budget from the actual tile footprint (double-buffered in/out tiles
    # + resident weights/bias) with headroom; stays well under v7x's 64 MiB.
    tile_vmem = (2 * K * TILE_HW * 2          # patches tile, bf16, 2 buffers
                 + 2 * E * TILE_HW * 4        # output tile, f32, 2 buffers
                 + E * K * 2 + E * 4)         # resident W (bf16) + bias (f32)
    vmem_limit = int(min(max(2 * tile_vmem + (1 << 20), 8 << 20), 64 << 20))

    cost = pl.CostEstimate(
        flops=2 * B * n_hw * TILE_HW * K * E,
        transcendentals=0,
        bytes_accessed=B * HW * K * 2 + E * K * 2 + E * 4 + B * HW * E * 4,
    )

    out = pl.pallas_call(
        _patch_embed_kernel,
        out_shape=jax.ShapeDtypeStruct((B, E, HW), x.dtype),
        grid=(B, n_hw),
        in_specs=[
            pl.BlockSpec((1, K, TILE_HW), lambda b, j: (b, 0, j)),  # patches (tiled)
            pl.BlockSpec((E, K), lambda b, j: (0, 0)),              # weight (resident)
            pl.BlockSpec((E, 1), lambda b, j: (0, 0)),              # bias   (resident)
        ],
        out_specs=pl.BlockSpec((1, E, TILE_HW), lambda b, j: (b, 0, j)),
        compiler_params=pltpu.CompilerParams(
            dimension_semantics=("parallel", "parallel"),
            vmem_limit_bytes=vmem_limit,
            allow_input_fusion=[True, False, False],
        ),
        cost_estimate=cost,
    )(patches, w_mat, b_col)

    # Output is already channel-major: NCHW is a free reshape (no transpose pass).
    # norm_layer=None -> nn.Identity(): nothing else to do.
    # TODO(synk): fuse patch extraction into the pallas input BlockSpec (index the
    # 6-D view of x directly) to also remove the im2col materialization in HBM.
    return out.reshape(B, E, Ho, Wo)


def _reference_conv(x, weight, bias, stride, padding):
    """Plain-JAX reference (lax conv) for a correctness check."""
    y = jax.lax.conv_general_dilated(
        x, weight, window_strides=(stride, stride),
        padding=[(padding, padding), (padding, padding)],
        dimension_numbers=("NCHW", "OIHW", "NCHW"))
    return y + bias.reshape(1, -1, 1, 1)


if __name__ == "__main__":
    key = jax.random.PRNGKey(0)

    # Case 1: PatchEmbed default style (stride == patch_size, padding == 0).
    # [2, 4, 16, 16] -> [2, 32, 4, 4]
    B, C, H, W = 2, 4, 16, 16
    patch_size, stride, padding = 4, 4, 0
    embed_dim = 32
    k1, k2, k3, key = jax.random.split(key, 4)
    x = jax.random.normal(k1, (B, C, H, W), dtype=jnp.float32)
    w = jax.random.normal(k2, (embed_dim, C, patch_size, patch_size),
                          dtype=jnp.float32) * 0.02
    b = jax.random.normal(k3, (embed_dim,), dtype=jnp.float32) * 0.02

    y = jax.block_until_ready(patch_embed_forward(
        x, w, b, patch_size=patch_size, stride=stride, padding=padding))
    y_ref = _reference_conv(x, w, b, stride, padding)
    assert y.shape == (B, embed_dim, H // stride, W // stride), y.shape
    # bf16 operands with f32 accumulation -> loosened tolerance vs f32 reference.
    assert jnp.allclose(y, y_ref, atol=2e-2, rtol=2e-2), "case 1 mismatch"

    # Case 2: overlapping / padded conv (exercises the generic im2col path).
    # [2, 3, 8, 8], patch 3, stride 2, pad 1 -> [2, 16, 4, 4]
    B2, C2, H2, W2 = 2, 3, 8, 8
    p2, s2, pad2 = 3, 2, 1
    e2 = 16
    k1, k2, k3, key = jax.random.split(key, 4)
    x2 = jax.random.normal(k1, (B2, C2, H2, W2), dtype=jnp.float32)
    w2 = jax.random.normal(k2, (e2, C2, p2, p2), dtype=jnp.float32) * 0.05
    b2 = jax.random.normal(k3, (e2,), dtype=jnp.float32) * 0.05

    y2 = jax.block_until_ready(patch_embed_forward(
        x2, w2, b2, patch_size=p2, stride=s2, padding=pad2))
    y2_ref = _reference_conv(x2, w2, b2, s2, pad2)
    assert y2.shape == y2_ref.shape, (y2.shape, y2_ref.shape)
    assert jnp.allclose(y2, y2_ref, atol=2e-2, rtol=2e-2), "case 2 mismatch"

    print("KERNEL_OK")
</pallas_src>

<mosaic_0001>
module attributes {stable_mosaic.version = 11 : i64} {
  func.func @_patch_embed_kernel(%arg0: i32, %arg1: i32, %arg2: memref<1x64x16xbf16, #tpu.memory_space<vmem>>, %arg3: memref<32x64xbf16, #tpu.memory_space<vmem>>, %arg4: memref<32x1xf32, #tpu.memory_space<vmem>>, %arg5: memref<1x32x16xf32, #tpu.memory_space<vmem>>) attributes {dimension_semantics = [#tpu.dimension_semantics<parallel>, #tpu.dimension_semantics<parallel>], iteration_bounds = array<i64: 2, 1>, scalar_prefetch = 0 : i64, scratch_operands = 0 : i64, tpu.core_type = #tpu.core_type<tc>, window_params = [{transform_indices = @transform_0, window_bounds = array<i64: 1, 64, 16>}, {pipeline_mode = #tpu.pipeline_mode<synchronous>, transform_indices = @transform_1, window_bounds = array<i64: 32, 64>}, {pipeline_mode = #tpu.pipeline_mode<synchronous>, transform_indices = @transform_2, window_bounds = array<i64: 32, 1>}, {transform_indices = @transform_3, window_bounds = array<i64: 1, 32, 16>}]} {
    %c0 = arith.constant 0 : index
    %c0_0 = arith.constant 0 : index
    %0 = vector.load %arg3[%c0, %c0_0] : memref<32x64xbf16, #tpu.memory_space<vmem>>, vector<32x64xbf16>
    %c0_1 = arith.constant 0 : index
    %c0_2 = arith.constant 0 : index
    %c0_3 = arith.constant 0 : index
    %1 = vector.load %arg2[%c0_1, %c0_2, %c0_3] : memref<1x64x16xbf16, #tpu.memory_space<vmem>>, vector<1x64x16xbf16>
    %2 = vector.shape_cast %1 : vector<1x64x16xbf16> to vector<64x16xbf16>
    %cst = arith.constant dense<0.000000e+00> : vector<32x16xf32>
    %3 = tpu.matmul %0, %2, %cst {dimension_numbers = #tpu.dot_dimension_numbers<[1], [0], [0], [1], [0, 0, 1, 1], [], []>} : vector<32x64xbf16>, vector<64x16xbf16>, vector<32x16xf32> -> vector<32x16xf32>
    %c0_4 = arith.constant 0 : index
    %c0_5 = arith.constant 0 : index
    %4 = vector.load %arg4[%c0_4, %c0_5] : memref<32x1xf32, #tpu.memory_space<vmem>>, vector<32x1xf32>
    %5 = vector.broadcast %4 : vector<32x1xf32> to vector<32x16xf32>
    %6 = arith.addf %3, %5 : vector<32x16xf32>
    %c0_6 = arith.constant 0 : index
    %c0_7 = arith.constant 0 : index
    %c0_8 = arith.constant 0 : index
    %7 = vector.load %arg5[%c0_6, %c0_7, %c0_8] : memref<1x32x16xf32, #tpu.memory_space<vmem>>, vector<1x32x16xf32>
    %8 = vector.shape_cast %7 : vector<1x32x16xf32> to vector<32x16xf32>
    %9 = vector.shape_cast %6 : vector<32x16xf32> to vector<1x32x16xf32>
    tpu.vector_store %arg5[%c0_6, %c0_7, %c0_8], %9 {strides = array<i32>} : memref<1x32x16xf32, #tpu.memory_space<vmem>>, vector<1x32x16xf32>,
    return
  }
  func.func @transform_0(%arg0: i32, %arg1: i32) -> (i32, i32, i32) {
    %c0_i32 = arith.constant 0 : i32
    %c0_i32_0 = arith.constant 0 : i32
    return %arg0, %c0_i32, %arg1 : i32, i32, i32
  }
  func.func @transform_1(%arg0: i32, %arg1: i32) -> (i32, i32) {
    %c0_i32 = arith.constant 0 : i32
    %c0_i32_0 = arith.constant 0 : i32
    %c0_i32_1 = arith.constant 0 : i32
    return %c0_i32, %c0_i32_0 : i32, i32
  }
  func.func @transform_2(%arg0: i32, %arg1: i32) -> (i32, i32) {
    %c0_i32 = arith.constant 0 : i32
    %c0_i32_0 = arith.constant 0 : i32
    %c0_i32_1 = arith.constant 0 : i32
    return %c0_i32, %c0_i32_0 : i32, i32
  }
  func.func @transform_3(%arg0: i32, %arg1: i32) -> (i32, i32, i32) {
    %c0_i32 = arith.constant 0 : i32
    %c0_i32_0 = arith.constant 0 : i32
    return %arg0, %c0_i32, %arg1 : i32, i32, i32
  }
}

</mosaic_0001>

<bundles_post_ra>
// kernel: patch_embed_forward.1
= control target key start
LH: loop header
LB: loop body
LE: loop exit
PB: predicated region body
PF: predicated region fallthrough
CT: control target
= control target key end

     0   :  { %s534_s12 = smov 0   ;;  %s536_s13 = smov 0   ;;  %s590_s0 = inlined_call_operand.vmem [shape: bf16[2,64,16], index: 0, kind: input, shape index: {}]   ;;  %s591_s1 = inlined_call_operand.vmem [shape: bf16[32,64], index: 1, kind: input, shape index: {}]   ;;  %s592_s2 = inlined_call_operand.vmem [shape: f32[32,1], index: 2, kind: input, shape index: {}]   ;;  %s593_s3 = inlined_call_operand.vmem [shape: f32[2,32,16], index: 3, kind: output, shape index: {}]  }
   0x1   :  { %s538_s14 = smov 0  }
   0x2 LB: > { %s25_s15 = sadd.s32 1, %s507_s13  ;;  %p421_p0 = scmp.ge.s32.totalorder %s511_s14, 1  ;;  %s511_s14 = sphi %s538_s14, %s13_s14   ;;  %s507_s13 = sphi %s536_s13, %s595_s13   ;;  %s503_s12 = sphi %s534_s12, %s594_s12  }
   0x3   : > { %p27_p1 = scmp.ge.s32.totalorder %s25_s15, 2  ;;  %p156_p2 = scmp.lt.s32.totalorder %s511_s14, 3 }
   0x5   : > { %s597_s15 = smov (%p27_p1, %s25_s15), 0  ;;  %p157_p3 = pnand %p421_p0, %p156_p2 }
   0x6   : > { %p186_p4 = scmp.lt.s32.totalorder (!%p157_p3), %s503_s12, 1  ;;  %v487_v0 = vld [vmem:[%s591_s1] sm:$0xff] (!%p157_p3)   ;;  %vm273_vm0 = vcmask (!%p157_p3), 523264   ;;  %v217_v1 = vld [vmem:[%s592_s2 + $0x10] sm:$0xff] (!%p157_p3)  ;;  %v513_v3 = vmov (!%p157_p3), 0   ;;  %v218_v4 = vld [vmem:[%s592_s2 + $0x18] sm:$0xff] (!%p157_p3) }
   0x7   : > { %160 = sbr.rel (%p157_p3) target bundleno = 252 (0xfc), region = 32  ;;  %452 = vmatprep.mubr.msk.bf16.mxu0 (!%p157_p3), %vm273_vm0, %v487_v0  ;;  %v215_v2 = vld [vmem:[%s592_s2] sm:$0xff] (!%p157_p3)  ;;  %482 = vset.pattern.permute.xlu1 (!%p157_p3), %v513_v3  ;;  %v216_v5 = vld [vmem:[%s592_s2 + $0x8] sm:$0xff] (!%p157_p3)  ;;  %vm329_vm1 = vcmask (!%p157_p3), 130048  }
   0x8   : > { %481 = vset.pattern.permute.xlu0 (!%p157_p3), %v513_v3  ;;  %231 = vperm.xlu1 (!%p157_p3), %482, %v217_v1   ;;  %v488_v10 = vld [vmem:[%s591_s1 + $0x8] sm:$0xff] (!%p157_p3)  }
   0x9   : > { %221 = vperm.xlu0 (!%p157_p3), %481, %v215_v2  }
   0xc   : > { %236 = vperm.xlu1 (!%p157_p3), %482, %v218_v4  }
   0xd   : > { %226 = vperm.xlu0 (!%p157_p3), %481, %v216_v5  }
   0xe   : > { %s599_s12 = smov (!%p186_p4, %s503_s12), 1 }
   0xf   : > { %s436_s22 = sshll.u32 %s599_s12, 5 }
  0x10   : > { %s193_s25 = scalar_lea.vmem %s590_s0, %s436_s22  ;;  %s201_s7 = scalar_lea.vmem %s593_s3, %s436_s22 }
  0x11   : > { %v483_v6 = vld [vmem:[%s193_s25] sm:$0xff]   ;;  %v484_v7 = vld [vmem:[%s193_s25 + $0x8] sm:$0xff]   ;;  %v485_v8 = vld [vmem:[%s193_s25 + $0x10] sm:$0xff]  }
  0x12   : > { %444 = vmatprep.subr.bf16.mxu0 %v483_v6  ;;  %v486_v9 = vld [vmem:[%s193_s25 + $0x18] sm:$0xff]  }
  0x13   : > { %445 = vmatpush3.bf16.msra.mxu0 %v483_v6 }
  0x14   : > { %446 = vmatprep.subr.bf16.mxu0 %v484_v7 }
  0x17   : > { %447 = vmatpush3.bf16.msra.mxu0 %v484_v7 }
  0x18   : > { %448 = vmatprep.subr.bf16.mxu0 %v485_v8 }
  0x1b   : > { %449 = vmatpush3.bf16.msra.mxu0 %v485_v8 }
  0x1c   : > { %450 = vmatprep.subr.bf16.mxu0 %v486_v9 }
  0x1f   : > { %451 = vmatpush3.bf16.msra.mxu0 %v486_v9 }
  0x22   : > { %453 = vmatmul.mubr.msk.bf16.vlgmr.msra.gmra.mrb[0].mxu0 %vm273_vm0, %v488_v10 }
  0x87   : > { %v232_v11 = vpop.permute.xlu1 %231 }
  0x88   : > { %v222_v12 = vpop.permute.xlu0 %221 }
  0x8b   : > { %v237_v16 = vpop.permute.xlu1 %236 }
  0x8c   : > { %v227_v19 = vpop.permute.xlu0 %226 }
  0xf5   : > { %v454_v13 = vpop.f32.mrb[0].mxu0 }
  0xf6   : > { %v323_v14 = vadd.f32 %v454_v13, %v232_v11  ;;  %v314_v15 = vpop.f32.mrb[1].mxu0 }
  0xf7   : > { %v315_v17 = vadd.f32 %v314_v15, %v222_v12  ;;  %v455_v18 = vpop.f32.mrb[2].mxu0 }
  0xf8   : > { %332 = vst.msk [vmem:[%s201_s7 + $0x10] sm:$0xff] %vm329_vm1, %v323_v14  ;;  %v326_v20 = vadd.f32 %v455_v18, %v237_v16  ;;  %v317_v21 = vpop.f32.mrb[3].mxu0 }
  0xf9   : > { %330 = vst.msk [vmem:[%s201_s7] sm:$0xff] %vm329_vm1, %v315_v17  ;;  %v318_v22 = vadd.f32 %v317_v21, %v227_v19 }
  0xfa   : > { %333 = vst.msk [vmem:[%s201_s7 + $0x18] sm:$0xff] %vm329_vm1, %v326_v20 }
  0xfb   : > { %331 = vst.msk [vmem:[%s201_s7 + $0x8] sm:$0xff] %vm329_vm1, %v318_v22 }
  0xfc PF: > { %s13_s14 = sadd.s32 1, %s511_s14   ;;  %s594_s12 = smov %s507_s13 }
  0xfd   : > { %p10_p5 = scmp.ge.s32.totalorder %s13_s14, 4   ;;  %s595_s13 = smov %s597_s15 }
  0xff   :  { %12 = sbr.rel (!%p10_p5) target bundleno = 2 (0x2), region = 62 }

</bundles_post_ra>
